<compile_context>
chip_gen: v6e
topology: v6e:2x2x1
jax: 0.10.0
libtpu: 0.0.40
codegen_flags: <defaults>
</compile_context>

<pallas_src>
import numpy as np
import jax
import jax.numpy as jnp
from jax import lax
from jax.experimental import pallas as pl
from jax.experimental.pallas import tpu as pltpu


def _detection_head_kernel(x_ref, w1_ref, b1_ref, w2_ref, b2_ref, o_ref):
    # x_ref : (1, Cin, TS)  f32   (one batch element, one spatial tile)
    # w1_ref: (Cmid, Cin)   bf16, b1_ref: (Cmid, 1) f32
    # w2_ref: (Cout, Cmid)  bf16, b2_ref: (Cout, 1) f32
    # o_ref : (1, Cout, TS) f32
    x = x_ref[0].astype(jnp.bfloat16)                      # (Cin, TS)
    h = jnp.dot(w1_ref[...], x,
                preferred_element_type=jnp.float32) + b1_ref[...]
    h = jnp.maximum(h, 0.1 * h)                            # LeakyReLU(0.1), VPU
    y = jnp.dot(w2_ref[...], h.astype(jnp.bfloat16),
                preferred_element_type=jnp.float32) + b2_ref[...]
    o_ref[0] = y


def _choose_spatial_tile(hw, cin, cmid, cout, vmem_budget_bytes=8 << 20):
    """Pick a lane-aligned spatial tile so double-buffered in/out blocks plus
    live intermediates stay well under scoped VMEM limits (v5e/v6e/v7x)."""
    per_col = (2 * cin * 4          # double-buffered f32 input block
               + 2 * cout * 4       # double-buffered f32 output block
               + cmid * (4 + 2)     # f32 intermediate h + its bf16 copy
               + cin * 2)           # bf16 copy of the input block
    tile = min(vmem_budget_bytes // max(per_col, 1), 4096)
    tile = max(128, (int(tile) // 128) * 128)              # lane-aligned
    hw_up = max(128, ((hw + 127) // 128) * 128)
    return min(tile, hw_up)


def detection_head_pallas(x_nchw, params):
    """Runs DetectionHead.forward. x_nchw: (B, Cin, H, W) f32, params in torch layout."""
    B, Cin, H, W = x_nchw.shape
    Cmid = params["w1"].shape[0]                           # in_channels // 2
    Cout = params["w2"].shape[0]                           # num_classes + 5
    assert params["w1"].shape[1] == Cin
    assert params["w2"].shape[1] == Cmid
    HW = H * W

    # torch conv weights (O, I, 1, 1) -> (O, I) matmul weights (no transpose).
    w1 = params["w1"][:, :, 0, 0].astype(jnp.bfloat16)     # (Cmid, Cin)
    w2 = params["w2"][:, :, 0, 0].astype(jnp.bfloat16)     # (Cout, Cmid)
    b1 = params["b1"].reshape(Cmid, 1).astype(jnp.float32)
    b2 = params["b2"].reshape(Cout, 1).astype(jnp.float32)

    ts = _choose_spatial_tile(HW, Cin, Cmid, Cout)
    hw_pad = ((HW + ts - 1) // ts) * ts
    x3 = x_nchw.reshape(B, Cin, HW).astype(jnp.float32)    # free reshape (contiguous)
    if hw_pad != HW:
        x3 = jnp.pad(x3, ((0, 0), (0, 0), (0, hw_pad - HW)))

    grid_spec = pltpu.PrefetchScalarGridSpec(
        num_scalar_prefetch=0,
        grid=(B, hw_pad // ts),
        in_specs=[
            pl.BlockSpec((1, Cin, ts), lambda b, s: (b, 0, s)),
            pl.BlockSpec((Cmid, Cin), lambda b, s: (0, 0)),
            pl.BlockSpec((Cmid, 1), lambda b, s: (0, 0)),
            pl.BlockSpec((Cout, Cmid), lambda b, s: (0, 0)),
            pl.BlockSpec((Cout, 1), lambda b, s: (0, 0)),
        ],
        out_specs=pl.BlockSpec((1, Cout, ts), lambda b, s: (b, 0, s)),
    )

    out3 = pl.pallas_call(
        _detection_head_kernel,
        out_shape=jax.ShapeDtypeStruct((B, Cout, hw_pad), jnp.float32),
        grid_spec=grid_spec,
        compiler_params=pltpu.CompilerParams(
            dimension_semantics=("parallel", "parallel")),  # shard tiles on v7x's 2 TCs
    )(x3, w1, b1, w2, b2)

    return out3[:, :, :HW].reshape(B, Cout, H, W)           # NCHW, free reshape


def detection_head_reference(x_nchw, params):
    """Pure-JAX NCHW reference matching the PyTorch module exactly (f32)."""
    dn = ("NCHW", "OIHW", "NCHW")

    def conv1x1(x, w, b):
        y = lax.conv_general_dilated(x, w, (1, 1), [(0, 0), (0, 0)],
                                     dimension_numbers=dn)
        return y + b[None, :, None, None]

    h = conv1x1(x_nchw, params["w1"], params["b1"])
    h = jnp.where(h > 0, h, 0.1 * h)                        # LeakyReLU(0.1)
    return conv1x1(h, params["w2"], params["b2"])


def make_params(key, in_channels, num_classes):
    cmid = in_channels // 2
    cout = num_classes + 5
    ks = jax.random.split(key, 4)
    scale = 0.1

    def w(k, shape):
        return (scale * jax.random.normal(k, shape)).astype(jnp.float32)

    return {
        "w1": w(ks[0], (cmid, in_channels, 1, 1)), "b1": w(ks[1], (cmid,)),
        "w2": w(ks[2], (cout, cmid, 1, 1)),        "b2": w(ks[3], (cout,)),
    }


if __name__ == "__main__":
    B, Cin, H, W = 2, 4, 16, 16
    num_classes = 3                                         # -> Cout = 8
    key = jax.random.PRNGKey(0)
    kx, kp = jax.random.split(key)
    x = jax.random.normal(kx, (B, Cin, H, W), dtype=jnp.float32)
    params = make_params(kp, Cin, num_classes)

    out = jax.block_until_ready(detection_head_pallas(x, params))
    ref = jax.block_until_ready(detection_head_reference(x, params))

    # bf16 matmuls with f32 accumulation -> relaxed tolerance vs the f32 reference
    np.testing.assert_allclose(np.asarray(out), np.asarray(ref),
                               rtol=2e-2, atol=2e-2)
    print("KERNEL_OK")
</pallas_src>

<mosaic_0001>
module attributes {stable_mosaic.version = 11 : i64} {
  func.func @_detection_head_kernel(%arg0: i32, %arg1: i32, %arg2: memref<1x4x256xf32, #tpu.memory_space<vmem>>, %arg3: memref<2x4xbf16, #tpu.memory_space<vmem>>, %arg4: memref<2x1xf32, #tpu.memory_space<vmem>>, %arg5: memref<8x2xbf16, #tpu.memory_space<vmem>>, %arg6: memref<8x1xf32, #tpu.memory_space<vmem>>, %arg7: memref<1x8x256xf32, #tpu.memory_space<vmem>>) attributes {dimension_semantics = [#tpu.dimension_semantics<parallel>, #tpu.dimension_semantics<parallel>], iteration_bounds = array<i64: 2, 1>, scalar_prefetch = 0 : i64, scratch_operands = 0 : i64, tpu.core_type = #tpu.core_type<tc>, window_params = [{transform_indices = @transform_0, window_bounds = array<i64: 1, 4, 256>}, {pipeline_mode = #tpu.pipeline_mode<synchronous>, transform_indices = @transform_1, window_bounds = array<i64: 2, 4>}, {pipeline_mode = #tpu.pipeline_mode<synchronous>, transform_indices = @transform_2, window_bounds = array<i64: 2, 1>}, {pipeline_mode = #tpu.pipeline_mode<synchronous>, transform_indices = @transform_3, window_bounds = array<i64: 8, 2>}, {pipeline_mode = #tpu.pipeline_mode<synchronous>, transform_indices = @transform_4, window_bounds = array<i64: 8, 1>}, {transform_indices = @transform_5, window_bounds = array<i64: 1, 8, 256>}]} {
    %c0 = arith.constant 0 : index
    %c0_0 = arith.constant 0 : index
    %c0_1 = arith.constant 0 : index
    %0 = vector.load %arg2[%c0, %c0_0, %c0_1] : memref<1x4x256xf32, #tpu.memory_space<vmem>>, vector<1x4x256xf32>
    %1 = vector.shape_cast %0 : vector<1x4x256xf32> to vector<4x256xf32>
    %2 = arith.truncf %1 : vector<4x256xf32> to vector<4x256xbf16>
    %c0_2 = arith.constant 0 : index
    %c0_3 = arith.constant 0 : index
    %3 = vector.load %arg3[%c0_2, %c0_3] : memref<2x4xbf16, #tpu.memory_space<vmem>>, vector<2x4xbf16>
    %cst = arith.constant dense<0.000000e+00> : vector<2x256xf32>
    %4 = tpu.matmul %3, %2, %cst {dimension_numbers = #tpu.dot_dimension_numbers<[1], [0], [0], [1], [0, 0, 1, 1], [], []>} : vector<2x4xbf16>, vector<4x256xbf16>, vector<2x256xf32> -> vector<2x256xf32>
    %c0_4 = arith.constant 0 : index
    %c0_5 = arith.constant 0 : index
    %5 = vector.load %arg4[%c0_4, %c0_5] : memref<2x1xf32, #tpu.memory_space<vmem>>, vector<2x1xf32>
    %6 = vector.broadcast %5 : vector<2x1xf32> to vector<2x256xf32>
    %7 = arith.addf %4, %6 : vector<2x256xf32>
    %cst_6 = arith.constant 1.000000e-01 : f32
    %8 = vector.broadcast %cst_6 : f32 to vector<2x256xf32>
    %9 = arith.mulf %8, %7 : vector<2x256xf32>
    %10 = arith.maximumf %7, %9 : vector<2x256xf32>
    %c0_7 = arith.constant 0 : index
    %c0_8 = arith.constant 0 : index
    %11 = vector.load %arg5[%c0_7, %c0_8] : memref<8x2xbf16, #tpu.memory_space<vmem>>, vector<8x2xbf16>
    %12 = arith.truncf %10 : vector<2x256xf32> to vector<2x256xbf16>
    %cst_9 = arith.constant dense<0.000000e+00> : vector<8x256xf32>
    %13 = tpu.matmul %11, %12, %cst_9 {dimension_numbers = #tpu.dot_dimension_numbers<[1], [0], [0], [1], [0, 0, 1, 1], [], []>} : vector<8x2xbf16>, vector<2x256xbf16>, vector<8x256xf32> -> vector<8x256xf32>
    %c0_10 = arith.constant 0 : index
    %c0_11 = arith.constant 0 : index
    %14 = vector.load %arg6[%c0_10, %c0_11] : memref<8x1xf32, #tpu.memory_space<vmem>>, vector<8x1xf32>
    %15 = vector.broadcast %14 : vector<8x1xf32> to vector<8x256xf32>
    %16 = arith.addf %13, %15 : vector<8x256xf32>
    %c0_12 = arith.constant 0 : index
    %c0_13 = arith.constant 0 : index
    %c0_14 = arith.constant 0 : index
    %17 = vector.load %arg7[%c0_12, %c0_13, %c0_14] : memref<1x8x256xf32, #tpu.memory_space<vmem>>, vector<1x8x256xf32>
    %18 = vector.shape_cast %17 : vector<1x8x256xf32> to vector<8x256xf32>
    %19 = vector.shape_cast %16 : vector<8x256xf32> to vector<1x8x256xf32>
    tpu.vector_store %arg7[%c0_12, %c0_13, %c0_14], %19 {strides = array<i32>} : memref<1x8x256xf32, #tpu.memory_space<vmem>>, vector<1x8x256xf32>,
    return
  }
  func.func @transform_0(%arg0: i32, %arg1: i32) -> (i32, i32, i32) {
    %c0_i32 = arith.constant 0 : i32
    %c0_i32_0 = arith.constant 0 : i32
    return %arg0, %c0_i32, %arg1 : i32, i32, i32
  }
  func.func @transform_1(%arg0: i32, %arg1: i32) -> (i32, i32) {
    %c0_i32 = arith.constant 0 : i32
    %c0_i32_0 = arith.constant 0 : i32
    %c0_i32_1 = arith.constant 0 : i32
    return %c0_i32, %c0_i32_0 : i32, i32
  }
  func.func @transform_2(%arg0: i32, %arg1: i32) -> (i32, i32) {
    %c0_i32 = arith.constant 0 : i32
    %c0_i32_0 = arith.constant 0 : i32
    %c0_i32_1 = arith.constant 0 : i32
    return %c0_i32, %c0_i32_0 : i32, i32
  }
  func.func @transform_3(%arg0: i32, %arg1: i32) -> (i32, i32) {
    %c0_i32 = arith.constant 0 : i32
    %c0_i32_0 = arith.constant 0 : i32
    %c0_i32_1 = arith.constant 0 : i32
    return %c0_i32, %c0_i32_0 : i32, i32
  }
  func.func @transform_4(%arg0: i32, %arg1: i32) -> (i32, i32) {
    %c0_i32 = arith.constant 0 : i32
    %c0_i32_0 = arith.constant 0 : i32
    %c0_i32_1 = arith.constant 0 : i32
    return %c0_i32, %c0_i32_0 : i32, i32
  }
  func.func @transform_5(%arg0: i32, %arg1: i32) -> (i32, i32, i32) {
    %c0_i32 = arith.constant 0 : i32
    %c0_i32_0 = arith.constant 0 : i32
    return %arg0, %c0_i32, %arg1 : i32, i32, i32
  }
}

</mosaic_0001>

<bundles_post_ra>
// kernel: tpu_custom_call.1
= control target key start
LH: loop header
LB: loop body
LE: loop exit
PB: predicated region body
PF: predicated region fallthrough
CT: control target
= control target key end

     0   :  { %10 = vsyncpa [#allocation3], 0  ;;  %s877_s0 = inlined_call_operand.vmem [shape: f32[2,4,256], index: 0, kind: input, shape index: {}]   ;;  %s878_s1 = inlined_call_operand.hbm [shape: bf16[2,4], index: 1, kind: input, shape index: {}]   ;;  %s879_s2 = inlined_call_operand.vmem [shape: f32[2,1], index: 2, kind: input, shape index: {}]   ;;  %s880_s3 = inlined_call_operand.vmem [shape: bf16[8,2], index: 3, kind: input, shape index: {}]   ;;  %s881_s4 = inlined_call_operand.vmem [shape: f32[8,1], index: 4, kind: input, shape index: {}]   ;;  %s882_s5 = inlined_call_operand.hbm [shape: f32[2,8,256], index: 5, kind: output, shape index: {}]  }
   0x1   :  { %11 = vsyncpa [#allocation4], 0 }
   0x2   :  { %13 = vsyncpa [#allocation4 + $0x1], 0  ;;  %s736_s18 = smov 0   ;;  %s738_s19 = smov 0  }
   0x3   :  { %s740_s20 = smov 0   ;;  %s742_s21 = smov 0  }
   0x4   :  { %s744_s22 = smov 0   ;;  %s746_s23 = smov 0  }
   0x5 LB: > { %s505_s24 = sadd.s32 4294967295, %s701_s23   ;;  %s506_s25 = sadd.s32 4294967294, %s701_s23   ;;  %s701_s23 = sphi %s746_s23, %s19_s23   ;;  %s697_s22 = sphi %s744_s22, %s891_s22   ;;  %s693_s21 = sphi %s742_s21, %s890_s21   ;;  %s689_s20 = sphi %s740_s20, %s889_s20   ;;  %s685_s19 = sphi %s738_s19, %s888_s19   ;;  %s681_s18 = sphi %s736_s18, %s887_s18  }
   0x6   : > { %s31_s26 = sadd.s32 1, %s697_s22  ;;  %s152_s27 = sadd.s32 1, %s689_s20 }
   0x7   : > { %p33_p0 = scmp.ge.s32.totalorder %s31_s26, 2  ;;  %p162_p1 = scmp.ne.s32.totalorder %s689_s20, %s685_s19 }
   0x8   : > { %p163_p2 = scmp.eq.s32.totalorder %s505_s24, 1  ;;  %p168_p3 = scmp.ne.s32.totalorder %s685_s19, %s681_s18 }
   0x9   : > { %s893_s26 = smov (%p33_p0, %s31_s26), 0  ;;  %p169_p5 = scmp.eq.s32.totalorder %s506_s25, 1 }
   0xa   : > { %p776_p4 = por %p163_p2, %p162_p1  ;;  %s147_s29 = ssub.s32 %s697_s22, %s893_s26 }
   0xb   : > { %p507_p6 = scmp.ge.s32.totalorder %s701_s23, 1  ;;  %p150_p7 = scmp.eq.s32.totalorder %s147_s29, 0 }
   0xc   : > { %p783_p8 = por %p169_p5, %p168_p3  ;;  %p176_p9 = scmp.lt.s32.totalorder %s701_s23, 3 }
   0xd   : > { %s789_s6 = scalar_select %p150_p7, %s689_s20, %s152_s27  }
   0xe   : > { %p791_p10 = pnand %p507_p6, %p176_p9  ;;  %p795_p11 = scmp.eq.s32.totalorder %s505_s24, 0 }
   0xf   : > { %s703_s9 = smov [#allocation2]  }
  0x10   : > { %p532_p12 = pneg %p791_p10  ;;  %s189_s10 = sshll.u32 %s703_s9, 4  ;;  %s190_s10 = int_to_ptr.vmem [resolvable:$true] %s189_s10 }
  0x11   : > { %s606_s11 = scalar_lea.vmem %s190_s10, 16  ;;  %s613_s12 = scalar_lea.vmem %s190_s10, 32 }
  0x12   : > { %p533_p13 = pnand %p795_p11, %p532_p12  ;;  %p607_p1 = scmp.ne.s32.totalorder %s190_s10, %s606_s11 }
  0x13   : > { %p614_p5 = scmp.lt.s32.totalorder %s190_s10, %s190_s10  ;;  %p615_p6 = scmp.lt.s32.totalorder %s613_s12, %s606_s11 }
  0x14   : > { %p597_p0 = pneg %p533_p13 }
  0x15   : > { %p616_p7 = por %p615_p6, %p614_p5 }
  0x16   : > { %p609_p2 = pnand %p607_p1, %p597_p0 }
  0x18   : > { %p610_p3 = pneg %p609_p2 }
  0x1a   : > { %p617_p9 = pnand %p616_p7, %p610_p3 }
  0x1c   : > { %620 = shalt.err (!%p617_p9)
}
  0x1d   : > { %535 = dma.hbm_to_vmem [thread:$0]  (!%p533_p13), %s878_s1, 16, %s190_s10, [#allocation3]  }
  0x1e   : > { %224 = sbr.rel (%p791_p10) target bundleno = 469 (0x1d5), region = 40 }
  0x23   : > { %672 = dma.done.wait (%p795_p11), [#allocation3], 16  }
  0x24   : > { %674 = vsyncadd (%p795_p11), [#allocation3], 4294967280  ;;  %p257_p12 = scmp.lt.s32.totalorder %s693_s21, 1  ;;  %v704_v0 = vmov 0   ;;  %vm285_vm0 = vcmask 1041408   ;;  %v340_v5 = vld [vmem:[%s881_s4] sm:$0xff] }
  0x25   : > { %324 = vmatprep.mubr.bf16.mxu0 %v704_v0  ;;  %593 = vset.pattern.permute.xlu0 %v704_v0  ;;  %v275_v2 = vld [vmem:[%s879_s2] sm:$0x3]  ;;  %vm281_vm1 = vcmask 31744   ;;  %vm350_vm2 = vcmask 1040384   ;;  %vm346_vm3 = vcmask 15360   ;;  %s253_s11 = sand.u32 1, %s685_s19  }
  0x26   : > { %s258_s15 = scalar_select %p257_p12, %s693_s21, 1  ;;  %389 = vmatprep.mubr.bf16.mxu1 %v704_v0  ;;  %278 = vperm.xlu0 %593, %v275_v2   ;;  %v274_v8 = vld [vmem:[#allocation2] sm:$0x1] }
  0x27   : > { %v337_v23 = vld [vmem:[%s880_s3] sm:$0xf]  ;;  %s512_s12 = sshll.u32 %s253_s11, 4  ;;  %s525_s13 = sshll.u32 %s693_s21, 8 }
  0x28   : > { %s524_s16 = sshll.u32 %s258_s15, 3  ;;  %s255_s14 = scalar_lea.vmem [#allocation5], %s512_s12 }
  0x29   : > { %s264_s25 = scalar_lea.vmem %s877_s0, %s524_s16  ;;  %s417_s15 = sshll.u32 %s255_s14, 4  ;;  %s833_s15 = int_to_ptr.vmem [resolvable:$true] %s417_s15 }
  0x2a   : > { %v268_v1 = vld [vmem:[%s264_s25] sm:$0xff]  ;;  %343 = vperm.xlu0 %593, %v340_v5   ;;  %s831_s24 = scalar_lea.hbm %s882_s5, %s525_s13  ;;  %s401_s21 = scalar_lea.sflag [#allocation4], %s253_s11 }
  0x2b   : > { %v270_v3 = vcombine.high %v268_v1, %v268_v1  ;;  %v272_v4 = vpack.c.bf16 %v268_v1, %v268_v1  ;;  %s621_s25 = scalar_lea.vmem %s833_s15, 256  ;;  %s705_s27 = smov [#allocation5]  }
  0x2c   : > { %p622_p10 = scmp.ne.s32.totalorder %s833_s15, %s621_s25  ;;  %s625_s29 = sshll.u32 %s705_s27, 4  ;;  %s626_s29 = int_to_ptr.vmem [resolvable:$false] %s625_s29 }
  0x2d   : > { %v273_v6 = vpack.c.bf16 %v270_v3, %v270_v3  ;;  %v287_v7 = vsel %vm285_vm0, %v272_v4, 0  ;;  %s627_s7 = scalar_lea.vmem %s626_s29, 512  ;;  %p628_p0 = scmp.lt.s32.totalorder %s833_s15, %s626_s29 }
  0x2e   : > { %p623_p11 = pnand %p622_p10, %p776_p4  ;;  %p629_p1 = scmp.lt.s32.totalorder %s627_s7, %s621_s25 }
  0x2f   : > { %515 = vmatprep.subr.msk.bf16.mxu0 %vm285_vm0, %v273_v6 }
  0x30   : > { %307 = vmatpush1.bf16.msra.mxu0 %v287_v7  ;;  %p624_p13 = pneg %p623_p11  ;;  %p630_p2 = por %p629_p1, %p628_p0 }
  0x32   : > { %p631_p3 = pnand %p630_p2, %p624_p13 }
  0x33   : > { %516 = vmatmul.mubr.msk.bf16.vlgmr.msra.gmra.mxu0 %vm281_vm1, %v274_v8 }
  0xa1   : > { %v279_v9 = vpop.permute.xlu0 %278 }
  0xa5   : > { %v344_v24 = vpop.permute.xlu0 %343 }
  0xf3   : > { %v326_v10 = vpop.f32.mrf.mxu0 }
  0xf4   : > { %v327_v11 = vadd.f32 %v326_v10, %v279_v9 }
  0xf5   : > { %v328_v12 = vpop.f32.mrf.mxu0 }
  0xf6   : > { %v333_v13 = vmul.f32 0.1, %v327_v11  ;;  %v329_v14 = vadd.f32 %v328_v12, %v279_v9 }
  0xf7   : > { %v330_v15 = vpop.f32.mrf.mxu0 }
  0xf8   : > { %v335_v16 = vmax.f32 %v327_v11, %v333_v13  ;;  %v334_v17 = vmul.f32 0.1, %v329_v14 }
  0xf9   : > { %v331_v18 = vpop.f32.mrf.mxu0 }
  0xfa   : > { %v336_v19 = vmax.f32 %v329_v14, %v334_v17  ;;  %v338_v20 = vpack.c.bf16 %v335_v16, %v335_v16 }
  0xfc   : > { %v339_v21 = vpack.c.bf16 %v336_v19, %v336_v19  ;;  %v352_v22 = vsel %vm350_vm2, %v338_v20, 0 }
  0xfe   : > { %517 = vmatprep.subr.msk.bf16.mxu1 %vm350_vm2, %v339_v21 }
  0xff   : > { %372 = vmatpush1.bf16.msra.mxu1 %v352_v22 }
 0x102   : > { %518 = vmatmul.mubr.msk.bf16.vlgmr.msra.gmra.mxu1 %vm346_vm3, %v337_v23 }
 0x1c2   : > { %v391_v25 = vpop.f32.mrf.mxu1 }
 0x1c3   : > { %v392_v26 = vadd.f32 %v391_v25, %v344_v24 }
 0x1c4   : > { %v393_v27 = vpop.f32.mrf.mxu1 }
 0x1c5   : > { %398 = vst [vmem:[%s255_s14] sm:$0xff] %v392_v26  ;;  %v394_v28 = vadd.f32 %v393_v27, %v344_v24 }
 0x1c6   : > { %v395_v29 = vpop.f32.mrf.mxu1 }
 0x1c7   : > { %399 = vst [vmem:[%s255_s14 + $0x8] sm:$0xff] %v394_v28 }
 0x1c8   : > { %v396_v30 = vpop.f32.mrf.mxu1 }
 0x1c9   : > { %634 = shalt.err (!%p631_p3)
}
 0x1ca   : > { %s635_s8 = scalar_lea.hbm %s831_s24, 256  ;;  %s639_s11 = scalar_lea.hbm %s882_s5, 512 }
 0x1cb   : > { %p636_p5 = scmp.ne.s32.totalorder %s831_s24, %s635_s8  ;;  %p640_p9 = scmp.lt.s32.totalorder %s831_s24, %s882_s5 }
 0x1cc   : > { %p641_p12 = scmp.lt.s32.totalorder %s639_s11, %s635_s8 }
 0x1cd   : > { %p637_p6 = pnand %p636_p5, %p776_p4 }
 0x1ce   : > { %p642_p10 = por %p641_p12, %p640_p9 }
 0x1cf   : > { %p638_p7 = pneg %p637_p6 }
 0x1d1   : > { %p643_p11 = pnand %p642_p10, %p638_p7 }
 0x1d3   : > { %646 = shalt.err (!%p643_p11)
}
 0x1d4   : > { %530 = dma.vmem_to_hbm [thread:$0]  (%p776_p4), %s833_s15, 256, %s831_s24, %s401_s21  }
 0x1d5 PF: > { %p542_p13 = scmp.ge.s32.totalorder %s701_s23, 2  ;;  %s429_s14 = sand.u32 1, %s681_s18  }
 0x1d6   : > { %s430_s16 = scalar_lea.sflag [#allocation4], %s429_s14 }
 0x1d7   : > { %p537_p0 = pnand %p542_p13, %p783_p8 }
 0x1d9   : > { %p538_p1 = pneg %p537_p0 }
 0x1db   : > { %676 = dma.done.wait (%p538_p1), %s430_s16, 256  }
 0x1dc   : > { %678 = vsyncadd (%p538_p1), %s430_s16, 4294967040  ;;  %s19_s23 = sadd.s32 1, %s701_s23   ;;  %s887_s18 = smov %s685_s19 }
 0x1dd   : > { %p16_p2 = scmp.ge.s32.totalorder %s19_s23, 4   ;;  %s888_s19 = smov %s689_s20 }
 0x1de   : > { %s889_s20 = smov %s789_s6  ;;  %s890_s21 = smov %s697_s22 }
 0x1df   : > { %s891_s22 = smov %s893_s26  ;;  %18 = sbr.rel (!%p16_p2) target bundleno = 5 (0x5), region = 80 }
 0x1e4   :  { %435 = vsyncpa [#allocation3], 1 }
 0x1e5   :  { %437 = vsyncpa [#allocation3 + $0x1], 1 }
 0x1e6   :  { %438 = vsyncpa [#allocation4], 1 }
 0x1e7   :  { %440 = vsyncpa [#allocation4 + $0x1], 1 }

</bundles_post_ra>
